<compile_context>
chip_gen: v6e
topology: v6e:2x2x1
jax: 0.10.0
libtpu: 0.0.40
codegen_flags: <defaults>
</compile_context>

<pallas_src>
import jax
import jax.numpy as jnp
from jax.experimental import pallas as pl
from jax.experimental.pallas import tpu as pltpu


def fused_mlp_kernel(x_ref, w1_ref, b1_ref, w2_ref, b2_ref, out_ref):
    # x: (tb, 8), w1: (8, 4), b1: (1, 4), w2: (4, 8), b2: (1, 8), out: (tb, 12)
    x = x_ref[...]
    w1 = w1_ref[...]
    w2 = w2_ref[...]
    tb = x.shape[0]
    d_in = x.shape[1]       # 8
    d_h = w1.shape[1]       # 4
    d_o = w2.shape[1]       # 8

    # Layer 1: accumulator initialized with the (broadcast) bias; unrolled
    # K=8 VPU multiply-add (no MXU for an 8x4 contraction).
    n1 = jnp.broadcast_to(b1_ref[...], (tb, d_h))
    for k in range(d_in):
        n1 = n1 + x[:, k:k + 1] * w1[k:k + 1, :]

    # Layer 2: same pattern, K=4.
    n2 = jnp.broadcast_to(b2_ref[...], (tb, d_o))
    for k in range(d_h):
        n2 = n2 + n1[:, k:k + 1] * w2[k:k + 1, :]

    # Single lane-concatenated output slab -> one store stream.
    out_ref[...] = jnp.concatenate([n1, n2], axis=-1)


def model_forward(x, w1, b1, w2, b2, *, tile_b=512):
    B, d_in = x.shape
    d_h = w1.shape[1]          # 4
    d_o = w2.shape[1]          # 8
    d_cat = d_h + d_o          # 12

    # Batch tiling: full batch for small B, otherwise 512-row tiles
    # (pad B up to a multiple of the tile; padded rows are sliced off).
    if B <= tile_b:
        tb = B
        Bp = B
        x_p = x
    else:
        tb = tile_b
        Bp = pl.cdiv(B, tb) * tb
        x_p = jnp.pad(x, ((0, Bp - B), (0, 0))) if Bp != B else x

    out = pl.pallas_call(
        fused_mlp_kernel,
        out_shape=jax.ShapeDtypeStruct((Bp, d_cat), jnp.float32),
        grid=(Bp // tb,),
        in_specs=[
            pl.BlockSpec((tb, d_in), lambda i: (i, 0)),
            # Weights / biases: constant index_map -> stay VMEM-resident.
            pl.BlockSpec((d_in, d_h), lambda i: (0, 0)),
            pl.BlockSpec((1, d_h), lambda i: (0, 0)),
            pl.BlockSpec((d_h, d_o), lambda i: (0, 0)),
            pl.BlockSpec((1, d_o), lambda i: (0, 0)),
        ],
        out_specs=pl.BlockSpec((tb, d_cat), lambda i: (i, 0)),
        compiler_params=pltpu.CompilerParams(
            dimension_semantics=("parallel",),
        ),
    )(x_p, w1, b1, w2, b2)

    out = out[:B]
    n1 = out[:, :d_h]
    n2 = out[:, d_h:]
    return n1, n2


def init_params():
    """Deterministic init matching PyTorch Linear default (uniform +-1/sqrt(fan_in))."""
    k = jax.random.PRNGKey(0)
    k1, k2, k3, k4 = jax.random.split(k, 4)
    bound1 = 1.0 / jnp.sqrt(8.0)
    bound2 = 1.0 / jnp.sqrt(4.0)
    # stored as (in_features, out_features)
    w1 = jax.random.uniform(k1, (8, 4), jnp.float32, -bound1, bound1)
    b1 = jax.random.uniform(k2, (1, 4), jnp.float32, -bound1, bound1)
    w2 = jax.random.uniform(k3, (4, 8), jnp.float32, -bound2, bound2)
    b2 = jax.random.uniform(k4, (1, 8), jnp.float32, -bound2, bound2)
    return w1, b1, w2, b2


def _reference(x, w1, b1, w2, b2):
    n1 = x @ w1 + b1
    n2 = n1 @ w2 + b2
    return n1, n2


if __name__ == "__main__":
    w1, b1, w2, b2 = init_params()

    key = jax.random.PRNGKey(0)
    # (a) original model shape (1, 8); (b) batched case exercising the grid
    #     (1024 rows -> two 512-row tiles); (c) non-multiple batch (padding path).
    for batch in (1, 1024, 777):
        key, sub = jax.random.split(key)
        x = jax.random.normal(sub, (batch, 8), jnp.float32)

        n1, n2 = model_forward(x, w1, b1, w2, b2)
        jax.block_until_ready((n1, n2))

        n1_ref, n2_ref = _reference(x, w1, b1, w2, b2)
        assert n1.shape == (batch, 4) and n2.shape == (batch, 8)
        assert jnp.allclose(n1, n1_ref, atol=1e-5), f"n1 mismatch at B={batch}"
        assert jnp.allclose(n2, n2_ref, atol=1e-5), f"n2 mismatch at B={batch}"

    print("KERNEL_OK")
</pallas_src>

<mosaic_0001>
module attributes {stable_mosaic.version = 11 : i64} {
  func.func @fused_mlp_kernel(%arg0: i32, %arg1: memref<1x8xf32, #tpu.memory_space<vmem>>, %arg2: memref<8x4xf32, #tpu.memory_space<vmem>>, %arg3: memref<1x4xf32, #tpu.memory_space<vmem>>, %arg4: memref<4x8xf32, #tpu.memory_space<vmem>>, %arg5: memref<1x8xf32, #tpu.memory_space<vmem>>, %arg6: memref<1x12xf32, #tpu.memory_space<vmem>>) attributes {dimension_semantics = [#tpu.dimension_semantics<parallel>], iteration_bounds = array<i64: 1>, scalar_prefetch = 0 : i64, scratch_operands = 0 : i64, tpu.core_type = #tpu.core_type<tc>, window_params = [{transform_indices = @transform_0, window_bounds = array<i64: 1, 8>}, {pipeline_mode = #tpu.pipeline_mode<synchronous>, transform_indices = @transform_1, window_bounds = array<i64: 8, 4>}, {pipeline_mode = #tpu.pipeline_mode<synchronous>, transform_indices = @transform_2, window_bounds = array<i64: 1, 4>}, {pipeline_mode = #tpu.pipeline_mode<synchronous>, transform_indices = @transform_3, window_bounds = array<i64: 4, 8>}, {pipeline_mode = #tpu.pipeline_mode<synchronous>, transform_indices = @transform_4, window_bounds = array<i64: 1, 8>}, {transform_indices = @transform_5, window_bounds = array<i64: 1, 12>}]} {
    %c0 = arith.constant 0 : index
    %c0_0 = arith.constant 0 : index
    %0 = vector.load %arg1[%c0, %c0_0] : memref<1x8xf32, #tpu.memory_space<vmem>>, vector<1x8xf32>
    %c0_1 = arith.constant 0 : index
    %c0_2 = arith.constant 0 : index
    %1 = vector.load %arg2[%c0_1, %c0_2] : memref<8x4xf32, #tpu.memory_space<vmem>>, vector<8x4xf32>
    %c0_3 = arith.constant 0 : index
    %c0_4 = arith.constant 0 : index
    %2 = vector.load %arg4[%c0_3, %c0_4] : memref<4x8xf32, #tpu.memory_space<vmem>>, vector<4x8xf32>
    %c0_5 = arith.constant 0 : index
    %c0_6 = arith.constant 0 : index
    %3 = vector.load %arg3[%c0_5, %c0_6] : memref<1x4xf32, #tpu.memory_space<vmem>>, vector<1x4xf32>
    %4 = vector.extract_strided_slice %0 {offsets = [0, 0], sizes = [1, 1], strides = [1, 1]} : vector<1x8xf32> to vector<1x1xf32>
    %5 = vector.extract_strided_slice %1 {offsets = [0, 0], sizes = [1, 4], strides = [1, 1]} : vector<8x4xf32> to vector<1x4xf32>
    %6 = vector.broadcast %4 : vector<1x1xf32> to vector<1x4xf32>
    %7 = arith.mulf %6, %5 : vector<1x4xf32>
    %8 = arith.addf %3, %7 : vector<1x4xf32>
    %9 = vector.extract_strided_slice %0 {offsets = [0, 1], sizes = [1, 1], strides = [1, 1]} : vector<1x8xf32> to vector<1x1xf32>
    %10 = vector.extract_strided_slice %1 {offsets = [1, 0], sizes = [1, 4], strides = [1, 1]} : vector<8x4xf32> to vector<1x4xf32>
    %11 = vector.broadcast %9 : vector<1x1xf32> to vector<1x4xf32>
    %12 = arith.mulf %11, %10 : vector<1x4xf32>
    %13 = arith.addf %8, %12 : vector<1x4xf32>
    %14 = vector.extract_strided_slice %0 {offsets = [0, 2], sizes = [1, 1], strides = [1, 1]} : vector<1x8xf32> to vector<1x1xf32>
    %15 = vector.extract_strided_slice %1 {offsets = [2, 0], sizes = [1, 4], strides = [1, 1]} : vector<8x4xf32> to vector<1x4xf32>
    %16 = vector.broadcast %14 : vector<1x1xf32> to vector<1x4xf32>
    %17 = arith.mulf %16, %15 : vector<1x4xf32>
    %18 = arith.addf %13, %17 : vector<1x4xf32>
    %19 = vector.extract_strided_slice %0 {offsets = [0, 3], sizes = [1, 1], strides = [1, 1]} : vector<1x8xf32> to vector<1x1xf32>
    %20 = vector.extract_strided_slice %1 {offsets = [3, 0], sizes = [1, 4], strides = [1, 1]} : vector<8x4xf32> to vector<1x4xf32>
    %21 = vector.broadcast %19 : vector<1x1xf32> to vector<1x4xf32>
    %22 = arith.mulf %21, %20 : vector<1x4xf32>
    %23 = arith.addf %18, %22 : vector<1x4xf32>
    %24 = vector.extract_strided_slice %0 {offsets = [0, 4], sizes = [1, 1], strides = [1, 1]} : vector<1x8xf32> to vector<1x1xf32>
    %25 = vector.extract_strided_slice %1 {offsets = [4, 0], sizes = [1, 4], strides = [1, 1]} : vector<8x4xf32> to vector<1x4xf32>
    %26 = vector.broadcast %24 : vector<1x1xf32> to vector<1x4xf32>
    %27 = arith.mulf %26, %25 : vector<1x4xf32>
    %28 = arith.addf %23, %27 : vector<1x4xf32>
    %29 = vector.extract_strided_slice %0 {offsets = [0, 5], sizes = [1, 1], strides = [1, 1]} : vector<1x8xf32> to vector<1x1xf32>
    %30 = vector.extract_strided_slice %1 {offsets = [5, 0], sizes = [1, 4], strides = [1, 1]} : vector<8x4xf32> to vector<1x4xf32>
    %31 = vector.broadcast %29 : vector<1x1xf32> to vector<1x4xf32>
    %32 = arith.mulf %31, %30 : vector<1x4xf32>
    %33 = arith.addf %28, %32 : vector<1x4xf32>
    %34 = vector.extract_strided_slice %0 {offsets = [0, 6], sizes = [1, 1], strides = [1, 1]} : vector<1x8xf32> to vector<1x1xf32>
    %35 = vector.extract_strided_slice %1 {offsets = [6, 0], sizes = [1, 4], strides = [1, 1]} : vector<8x4xf32> to vector<1x4xf32>
    %36 = vector.broadcast %34 : vector<1x1xf32> to vector<1x4xf32>
    %37 = arith.mulf %36, %35 : vector<1x4xf32>
    %38 = arith.addf %33, %37 : vector<1x4xf32>
    %39 = vector.extract_strided_slice %0 {offsets = [0, 7], sizes = [1, 1], strides = [1, 1]} : vector<1x8xf32> to vector<1x1xf32>
    %40 = vector.extract_strided_slice %1 {offsets = [7, 0], sizes = [1, 4], strides = [1, 1]} : vector<8x4xf32> to vector<1x4xf32>
    %41 = vector.broadcast %39 : vector<1x1xf32> to vector<1x4xf32>
    %42 = arith.mulf %41, %40 : vector<1x4xf32>
    %43 = arith.addf %38, %42 : vector<1x4xf32>
    %c0_7 = arith.constant 0 : index
    %c0_8 = arith.constant 0 : index
    %44 = vector.load %arg5[%c0_7, %c0_8] : memref<1x8xf32, #tpu.memory_space<vmem>>, vector<1x8xf32>
    %45 = vector.extract_strided_slice %43 {offsets = [0, 0], sizes = [1, 1], strides = [1, 1]} : vector<1x4xf32> to vector<1x1xf32>
    %46 = vector.extract_strided_slice %2 {offsets = [0, 0], sizes = [1, 8], strides = [1, 1]} : vector<4x8xf32> to vector<1x8xf32>
    %47 = vector.broadcast %45 : vector<1x1xf32> to vector<1x8xf32>
    %48 = arith.mulf %47, %46 : vector<1x8xf32>
    %49 = arith.addf %44, %48 : vector<1x8xf32>
    %50 = vector.extract_strided_slice %43 {offsets = [0, 1], sizes = [1, 1], strides = [1, 1]} : vector<1x4xf32> to vector<1x1xf32>
    %51 = vector.extract_strided_slice %2 {offsets = [1, 0], sizes = [1, 8], strides = [1, 1]} : vector<4x8xf32> to vector<1x8xf32>
    %52 = vector.broadcast %50 : vector<1x1xf32> to vector<1x8xf32>
    %53 = arith.mulf %52, %51 : vector<1x8xf32>
    %54 = arith.addf %49, %53 : vector<1x8xf32>
    %55 = vector.extract_strided_slice %43 {offsets = [0, 2], sizes = [1, 1], strides = [1, 1]} : vector<1x4xf32> to vector<1x1xf32>
    %56 = vector.extract_strided_slice %2 {offsets = [2, 0], sizes = [1, 8], strides = [1, 1]} : vector<4x8xf32> to vector<1x8xf32>
    %57 = vector.broadcast %55 : vector<1x1xf32> to vector<1x8xf32>
    %58 = arith.mulf %57, %56 : vector<1x8xf32>
    %59 = arith.addf %54, %58 : vector<1x8xf32>
    %60 = vector.extract_strided_slice %43 {offsets = [0, 3], sizes = [1, 1], strides = [1, 1]} : vector<1x4xf32> to vector<1x1xf32>
    %61 = vector.extract_strided_slice %2 {offsets = [3, 0], sizes = [1, 8], strides = [1, 1]} : vector<4x8xf32> to vector<1x8xf32>
    %62 = vector.broadcast %60 : vector<1x1xf32> to vector<1x8xf32>
    %63 = arith.mulf %62, %61 : vector<1x8xf32>
    %64 = arith.addf %59, %63 : vector<1x8xf32>
    %65 = tpu.concatenate %43, %64 in 1 : vector<1x4xf32>, vector<1x8xf32> -> vector<1x12xf32>
    %c0_9 = arith.constant 0 : index
    %c0_10 = arith.constant 0 : index
    %66 = vector.load %arg6[%c0_9, %c0_10] : memref<1x12xf32, #tpu.memory_space<vmem>>, vector<1x12xf32>
    tpu.vector_store %arg6[%c0_9, %c0_10], %65 {strides = array<i32>} : memref<1x12xf32, #tpu.memory_space<vmem>>, vector<1x12xf32>,
    return
  }
  func.func @transform_0(%arg0: i32) -> (i32, i32) {
    %c0_i32 = arith.constant 0 : i32
    %c0_i32_0 = arith.constant 0 : i32
    return %arg0, %c0_i32 : i32, i32
  }
  func.func @transform_1(%arg0: i32) -> (i32, i32) {
    %c0_i32 = arith.constant 0 : i32
    %c0_i32_0 = arith.constant 0 : i32
    %c0_i32_1 = arith.constant 0 : i32
    return %c0_i32, %c0_i32_0 : i32, i32
  }
  func.func @transform_2(%arg0: i32) -> (i32, i32) {
    %c0_i32 = arith.constant 0 : i32
    %c0_i32_0 = arith.constant 0 : i32
    %c0_i32_1 = arith.constant 0 : i32
    return %c0_i32, %c0_i32_0 : i32, i32
  }
  func.func @transform_3(%arg0: i32) -> (i32, i32) {
    %c0_i32 = arith.constant 0 : i32
    %c0_i32_0 = arith.constant 0 : i32
    %c0_i32_1 = arith.constant 0 : i32
    return %c0_i32, %c0_i32_0 : i32, i32
  }
  func.func @transform_4(%arg0: i32) -> (i32, i32) {
    %c0_i32 = arith.constant 0 : i32
    %c0_i32_0 = arith.constant 0 : i32
    %c0_i32_1 = arith.constant 0 : i32
    return %c0_i32, %c0_i32_0 : i32, i32
  }
  func.func @transform_5(%arg0: i32) -> (i32, i32) {
    %c0_i32 = arith.constant 0 : i32
    %c0_i32_0 = arith.constant 0 : i32
    return %arg0, %c0_i32 : i32, i32
  }
}

</mosaic_0001>

<bundles_post_ra>
// kernel: tpu_custom_call.1
= control target key start
LH: loop header
LB: loop body
LE: loop exit
PB: predicated region body
PF: predicated region fallthrough
CT: control target
= control target key end

     0   :  { %v396_v1 = vmov 3   ;;  %v397_v2 = vmov 1   ;;  %s497_s0 = inlined_call_operand.vmem [shape: f32[1,8], index: 0, kind: input, shape index: {}]   ;;  %s498_s1 = inlined_call_operand.vmem [shape: f32[8,4], index: 1, kind: input, shape index: {}]   ;;  %s499_s2 = inlined_call_operand.vmem [shape: f32[1,4], index: 2, kind: input, shape index: {}]   ;;  %s500_s3 = inlined_call_operand.vmem [shape: f32[4,8], index: 3, kind: input, shape index: {}]   ;;  %s501_s4 = inlined_call_operand.vmem [shape: f32[1,8], index: 4, kind: input, shape index: {}]   ;;  %s502_s5 = inlined_call_operand.hbm [shape: f32[1,12], index: 5, kind: output, shape index: {}]  }
   0x1   :  { %v21_v0 = vld [vmem:[%s497_s0] sm:$0x1]  ;;  %363 = vset.pattern.permute.xlu1 %v396_v1  ;;  %361 = vset.pattern.permute.xlu0 %v397_v2 }
   0x2   :  { %91 = vperm.xlu1 %363, %v21_v0   ;;  %37 = vperm.xlu0 %361, %v21_v0  }
   0x3   :  { %10 = vsyncpa [#allocation3], 0  ;;  %v398_v3 = vmov 0   ;;  %v399_v4 = vmov 2   ;;  %v400_v5 = vmov 4   ;;  %v401_v6 = vmov 5  }
   0x4   :  { %v402_v7 = vmov 6   ;;  %v403_v8 = vmov 7   ;;  %v30_v9 = vlaneseq  ;;  %v404_v11 = vmov 1966171168   ;;  %v22_v15 = vld [vmem:[%s498_s1] sm:$0xff]  ;;  %s406_s24 = smov [#allocation2]  }
   0x5   :  { %v47_v12 = vunpack.c.l.s4 %v404_v11  ;;  %v24_v32 = vld [vmem:[%s499_s2] sm:$0x1]  ;;  %s342_s25 = sshll.u32 %s406_s24, 4  ;;  %vm332_vm0 = vcmask 31744   ;;  %vm334_vm1 = vcmask 90112   ;;  %s343_s25 = int_to_ptr.vmem [resolvable:$true] %s342_s25 }
   0x6   :  { %364 = vset.pattern.permute.xlu1 %v398_v3  ;;  %362 = vset.pattern.permute.xlu0 %v399_v4  ;;  %v31_v10 = vshrl.u32 %v30_v9, 7  ;;  %s374_s26 = scalar_lea.vmem %s343_s25, 16  ;;  %s378_s27 = scalar_lea.vmem %s343_s25, 32 }
   0x7   :  { %27 = vperm.xlu1 %364, %v21_v0   ;;  %64 = vperm.xlu0 %362, %v21_v0   ;;  %v48_v14 = vunpack.c.0.s8 %v47_v12  ;;  %p375_p0 = scmp.ne.s32.totalorder %s343_s25, %s374_s26  ;;  %p379_p1 = scmp.lt.s32.totalorder %s343_s25, %s343_s25 }
   0x8   :  { %v442_v13 = vsub.s32 0, %v31_v10  ;;  %p380_p2 = scmp.lt.s32.totalorder %s378_s27, %s374_s26 }
   0x9   :  { %v447_v18 = vsub.s32 %v48_v14, %v31_v10 }
   0xa   :  { %p381_p3 = por %p380_p2, %p379_p1 }
   0xb   :  { %365 = vset.pattern.permute.xlu1 %v400_v5  ;;  %366 = vset.pattern.permute.xlu0 %v401_v6 }
   0xc   :  { %119 = vperm.xlu1 %365, %v21_v0   ;;  %146 = vperm.xlu0 %366, %v21_v0   ;;  %p382_p4 = pnand %p381_p3, %p375_p0 }
  0x10   :  { %367 = vset.pattern.permute.xlu1 %v402_v7  ;;  %369 = vset.pattern.permute.xlu0 %v397_v2 }
  0x11   :  { %174 = vperm.xlu1 %367, %v21_v0  }
  0x15   :  { %368 = vset.pattern.permute.xlu1 %v403_v8 }
  0x16   :  { %202 = vperm.xlu1 %368, %v21_v0  }
  0x1a   :  { %370 = vset.pattern.permute.xlu1 %v399_v4 }
  0x7d   :  { %v92_v16 = vpop.permute.xlu1 %91  ;;  %v38_v17 = vpop.permute.xlu0 %37 }
  0x7e   :  { %v97_v19 = vrot.slane %v92_v16, %v442_v13  ;;  %v43_v20 = vrot.slane %v38_v17, %v442_v13 }
  0x80   :  { %v44_v21 = vmul.f32 %v43_v20, %v22_v15  ;;  %v98_v22 = vmul.f32 %v97_v19, %v22_v15 }
  0x82   :  { %v52_v23 = vrot.slane %v44_v21, %v447_v18  ;;  %v28_v24 = vpop.permute.xlu1 %27  ;;  %v65_v25 = vpop.permute.xlu0 %64  ;;  %v106_v28 = vrot.slane %v98_v22, %v447_v18 }
  0x83   :  { %v33_v26 = vrot.slane %v28_v24, %v442_v13  ;;  %v70_v27 = vrot.slane %v65_v25, %v442_v13 }
  0x84   :  { %v53_v30 = vcombine.high %v52_v23, %v52_v23  ;;  %v107_v38 = vcombine.high %v106_v28, %v106_v28  ;;  %v230_v28 = vld [vmem:[%s501_s4] sm:$0x1]  ;;  %s405_s4 = smov 4  }
  0x85   :  { %v71_v29 = vmul.f32 %v70_v27, %v22_v15  ;;  %v34_v31 = vmul.f32 %v33_v26, %v22_v15 }
  0x86   :  { %v60_v40 = vrot.slane %v53_v30, %v447_v18  ;;  %v114_v49 = vrot.slane %v107_v38, %v447_v18 }
  0x87   :  { %v79_v33 = vrot.slane %v71_v29, %v447_v18  ;;  %v120_v34 = vpop.permute.xlu1 %119  ;;  %v147_v35 = vpop.permute.xlu0 %146  ;;  %v35_v41 = vadd.f32 %v34_v31, %v24_v32 }
  0x88   :  { %v125_v36 = vrot.slane %v120_v34, %v442_v13  ;;  %v152_v37 = vrot.slane %v147_v35, %v442_v13  ;;  %v115_v57 = vcombine.high %v114_v49, %v114_v49 }
  0x89   :  { %v86_v39 = vrot.slane %v79_v33, %v447_v18  ;;  %v62_v50 = vadd.f32 %v60_v40, %v35_v41 }
  0x8a   :  { %v126_v42 = vmul.f32 %v125_v36, %v22_v15  ;;  %v153_v43 = vmul.f32 %v152_v37, %v22_v15 }
  0x8b   :  { %v87_v44 = vcombine.high %v86_v39, %v86_v39 }
  0x8c   :  { %v128_v45 = vcombine.high %v126_v42, %v126_v42  ;;  %v155_v46 = vcombine.high %v153_v43, %v153_v43  ;;  %v175_v47 = vpop.permute.xlu1 %174 }
  0x8d   :  { %v180_v48 = vrot.slane %v175_v47, %v442_v13  ;;  %v89_v52 = vadd.f32 %v87_v44, %v62_v50 }
  0x8e   :  { %v135_v53 = vrot.slane %v128_v45, %v447_v18  ;;  %v162_v54 = vrot.slane %v155_v46, %v447_v18 }
  0x8f   :  { %v181_v51 = vmul.f32 %v180_v48, %v22_v15  ;;  %v117_v60 = vadd.f32 %v115_v57, %v89_v52 }
  0x90   :  { %v142_v61 = vrot.slane %v135_v53, %v447_v18  ;;  %v163_v62 = vcombine.high %v162_v54, %v162_v54 }
  0x91   :  { %v183_v55 = vcombine.high %v181_v51, %v181_v51  ;;  %v203_v56 = vpop.permute.xlu1 %202 }
  0x92   :  { %v208_v58 = vrot.slane %v203_v56, %v442_v13  ;;  %v144_v4 = vadd.f32 %v142_v61, %v117_v60  ;;  %v170_v5 = vrot.slane %v163_v62, %v447_v18 }
  0x93   :  { %v190_v59 = vrot.slane %v183_v55, %v447_v18 }
  0x94   :  { %v209_v63 = vmul.f32 %v208_v58, %v22_v15  ;;  %v172_v9 = vadd.f32 %v170_v5, %v144_v4  ;;  %v23_v15 = vld [vmem:[%s500_s3] sm:$0xf] }
  0x95   :  { %v197_v0 = vrot.slane %v190_v59, %v447_v18 }
  0x96   :  { %v211_v2 = vcombine.high %v209_v63, %v209_v63 }
  0x97   :  { %v198_v7 = vcombine.high %v197_v0, %v197_v0 }
  0x98   :  { %v218_v6 = vrot.slane %v211_v2, %v447_v18 }
  0x99   :  { %v200_v11 = vadd.f32 %v198_v7, %v172_v9 }
  0x9a   :  { %v219_v8 = vcombine.high %v218_v6, %v218_v6 }
  0x9c   :  { %v226_v10 = vrot.slane %v219_v8, %v447_v18 }
  0x9e   :  { %v227_v12 = vcombine.high %v226_v10, %v226_v10 }
  0xa0   :  { %v229_v14 = vadd.f32 %v227_v12, %v200_v11 }
  0xa2   :  { %270 = vperm.xlu1 %370, %v229_v14   ;;  %243 = vperm.xlu0 %369, %v229_v14  }
  0xa6   :  { %371 = vset.pattern.permute.xlu1 %v396_v1  ;;  %372 = vset.pattern.permute.xlu0 %v398_v3 }
  0xa7   :  { %297 = vperm.xlu1 %371, %v229_v14   ;;  %233 = vperm.xlu0 %372, %v229_v14  }
  0xab   :  { %373 = vset.pattern.permute.xlu0 %v396_v1 }
 0x11d   :  { %v271_v16 = vpop.permute.xlu1 %270  ;;  %v244_v17 = vpop.permute.xlu0 %243 }
 0x11e   :  { %v276_v19 = vrot.slane %v271_v16, %v442_v13  ;;  %v249_v20 = vrot.slane %v244_v17, %v442_v13 }
 0x120   :  { %v277_v21 = vmul.f32 %v276_v19, %v23_v15  ;;  %v250_v22 = vmul.f32 %v249_v20, %v23_v15 }
 0x122   :  { %v258_v23 = vrot.slane %v250_v22, %v447_v18  ;;  %v298_v24 = vpop.permute.xlu1 %297  ;;  %v234_v3 = vpop.permute.xlu0 %233  ;;  %v285_v25 = vrot.slane %v277_v21, %v447_v18 }
 0x123   :  { %v303_v1 = vrot.slane %v298_v24, %v442_v13  ;;  %v239_v26 = vrot.slane %v234_v3, %v442_v13 }
 0x124   :  { %v259_v27 = vcombine.high %v258_v23, %v258_v23  ;;  %v292_v32 = vrot.slane %v285_v25, %v447_v18 }
 0x125   :  { %v304_v29 = vmul.f32 %v303_v1, %v23_v15  ;;  %v240_v30 = vmul.f32 %v239_v26, %v23_v15 }
 0x126   :  { %v266_v31 = vrot.slane %v259_v27, %v447_v18  ;;  %v293_v37 = vcombine.high %v292_v32, %v292_v32 }
 0x127   :  { %v312_v33 = vrot.slane %v304_v29, %v447_v18  ;;  %v241_v34 = vadd.f32 %v240_v30, %v230_v28 }
 0x129   :  { %v313_v35 = vcombine.high %v312_v33, %v312_v33  ;;  %v268_v36 = vadd.f32 %v266_v31, %v241_v34 }
 0x12b   :  { %v320_v38 = vrot.slane %v313_v35, %v447_v18  ;;  %v295_v40 = vadd.f32 %v293_v37, %v268_v36 }
 0x12d   :  { %v321_v39 = vcombine.high %v320_v38, %v320_v38 }
 0x12f   :  { %v323_v41 = vadd.f32 %v321_v39, %v295_v40 }
 0x131   :  { %v328_v42 = vrot.slane %v323_v41, %v442_v13 }
 0x133   :  { %329 = vrot.lane.b32.xlu1 %v328_v42, %s405_s4 }
 0x1a5   :  { %v330_v43 = vpop.permute.xlu1 %329 }
 0x1a6   :  { %v333_v44 = vsel %vm332_vm0, %v229_v14, %v330_v43 }
 0x1a7   :  { %335 = vst.msk [vmem:[#allocation2] sm:$0x1] %vm334_vm1, %v333_v44 }
 0x1a8   :  { %385 = shalt.err (!%p382_p4)
}
 0x1a9   :  { %345 = dma.vmem_to_hbm [thread:$0]  %s343_s25, 16, %s502_s5, [#allocation3]  }
 0x1aa   :  { %394 = dma.done.wait [#allocation3], 16  }
 0x1ab   :  { %395 = vsyncadd [#allocation3], 4294967280 }
 0x1ac   :  { %349 = vsyncpa [#allocation3], 1 }

</bundles_post_ra>
